<compile_context>
chip_gen: v7x
topology: tpu7x:2x2x1
jax: 0.10.0
libtpu: 0.0.40
codegen_flags: <defaults>
</compile_context>

<pallas_src>
import functools

import jax
import jax.numpy as jnp
from jax.experimental import pallas as pl
from jax.experimental.pallas import tpu as pltpu

LANE = 128      # lane width of a vreg (last-dim granule)
SUBLANE = 8     # sublane count of an f32 vreg (second-to-last-dim granule)


def _round_up(x: int, m: int) -> int:
    return ((x + m - 1) // m) * m


def _vmem_capacity_bytes() -> int:
    try:
        return int(pltpu.get_tpu_info().vmem_capacity_bytes)
    except Exception:
        return 64 * 1024 * 1024  # conservative default: v7x per-TC VMEM


def _fused_mlp_kernel(*refs, n_layers: int):
    """Fused MLP over one batch tile.

    refs = (x_ref, w_0, b_0, ..., w_{L-1}, b_{L-1}, o_ref)
      x_ref: (tm, K0_pad)              input tile (zero-padded)
      w_l:   (K_l_pad, N_l_pad) bf16   per-layer zero-padded weight (in, out)
      b_l:   (1, N_l_pad)       f32    per-layer zero-padded bias
      o_ref: (tm, N_last_pad)          output tile
    The activation is carried as an SSA value (no VMEM scratch round trips).
    """
    x_ref, o_ref = refs[0], refs[-1]
    act = x_ref[...].astype(jnp.bfloat16)   # bf16 operands -> native MXU
    y = None
    for l in range(n_layers):                # static Python unroll
        w_ref = refs[1 + 2 * l]
        b_ref = refs[2 + 2 * l]
        y = jnp.dot(act, w_ref[...], preferred_element_type=jnp.float32)
        y = y + b_ref[...]                   # f32 bias add in the accumulator
        if l < n_layers - 1:
            act = jnp.maximum(y, 0.0).astype(jnp.bfloat16)  # ReLU, hidden only
    o_ref[...] = y.astype(o_ref.dtype)


def prepare_generator_fc_params(params):
    """One-time padding/cast of per-layer params (hoisted out of the forward).

    Each weight (din, dout) -> bf16 zero-padded (round_up(din,128),
    round_up(dout,128)); each bias -> f32 zero-padded (1, round_up(dout,128)).
    """
    for l in range(len(params) - 1):
        assert params[l][0].shape[1] == params[l + 1][0].shape[0], \
            "consecutive layer dims must chain"
    prepared = []
    for (w, b) in params:
        din, dout = w.shape
        kp, npad = _round_up(din, LANE), _round_up(dout, LANE)
        w_p = jnp.zeros((kp, npad), jnp.bfloat16)
        w_p = w_p.at[:din, :dout].set(w.astype(jnp.bfloat16))
        b_p = jnp.zeros((1, npad), jnp.float32)
        b_p = b_p.at[0, :dout].set(b.astype(jnp.float32))
        prepared.append((w_p, b_p))
    return prepared


def generator_fc_forward(prepared_params, x, *, output_size, tile_m=512):
    """Forward pass of GeneratorFC on pre-padded params (see prepare_*)."""
    batch, input_size = x.shape
    n_layers = len(prepared_params)
    k0_pad = prepared_params[0][0].shape[0]
    n_out_pad = prepared_params[-1][0].shape[1]
    assert input_size <= k0_pad and output_size <= n_out_pad

    # Batch (M) tiling: sublane-aligned tile, and >=2 grid steps whenever the
    # batch allows so the "parallel" axis can shard across v7x's two TCs.
    # (Feature dims stay 128-lane aligned; padding to 256 for the 256-wide
    #  v6e/v7x MXU only pays off for large true dims.)
    padded_batch = _round_up(batch, SUBLANE)
    tm = min(_round_up(max(tile_m, 1), SUBLANE), padded_batch)
    if padded_batch >= 2 * SUBLANE:
        tm = min(tm, _round_up(-(-padded_batch // 2), SUBLANE))
    padded_batch = _round_up(padded_batch, tm)
    grid_m = padded_batch // tm

    # Zero-pad the input to (padded_batch, K0_pad).
    x_p = jnp.zeros((padded_batch, k0_pad), x.dtype)
    x_p = x_p.at[:batch, :input_size].set(x)

    # VMEM budget: single-buffered weights + double-buffered in/out tiles.
    weight_bytes = sum(w.size * w.dtype.itemsize + b.size * b.dtype.itemsize
                       for (w, b) in prepared_params)
    io_tile_bytes = 2 * tm * (k0_pad * x.dtype.itemsize + n_out_pad * 4)
    vmem_cap = _vmem_capacity_bytes()
    if weight_bytes + io_tile_bytes > int(0.8 * vmem_cap):
        # TODO(synk): tiled (M, N, K) reduction-grid fallback for weight sets
        # that exceed VMEM (notably v7x's 64 MiB).
        raise NotImplementedError(
            "GeneratorFC weights exceed the VMEM-resident budget; "
            "tiled reduction fallback not implemented.")
    vmem_limit = int(min(vmem_cap,
                         2 * weight_bytes + 2 * io_tile_bytes + (16 << 20)))

    in_specs = [pl.BlockSpec((tm, k0_pad), lambda i: (i, 0))]
    flat_wb = []
    for (w_p, b_p) in prepared_params:
        kp, npad = w_p.shape
        # Constant block index + single buffering: weights stay VMEM-resident
        # across batch tiles without a redundant second buffer.
        in_specs.append(pl.BlockSpec((kp, npad), lambda i: (0, 0),
                                     pipeline_mode=pl.Buffered(1)))
        in_specs.append(pl.BlockSpec((1, npad), lambda i: (0, 0),
                                     pipeline_mode=pl.Buffered(1)))
        flat_wb += [w_p, b_p]

    kernel = functools.partial(_fused_mlp_kernel, n_layers=n_layers)
    out_p = pl.pallas_call(
        kernel,
        out_shape=jax.ShapeDtypeStruct((padded_batch, n_out_pad), x.dtype),
        grid_spec=pltpu.PrefetchScalarGridSpec(
            num_scalar_prefetch=0,
            grid=(grid_m,),
            in_specs=in_specs,
            out_specs=pl.BlockSpec((tm, n_out_pad), lambda i: (i, 0)),
        ),
        compiler_params=pltpu.CompilerParams(
            dimension_semantics=("parallel",),
            vmem_limit_bytes=vmem_limit),
    )(x_p, *flat_wb)

    return out_p[:batch, :output_size]


def init_generator_fc_params(key, input_size, output_size, hidden_dims):
    """Deterministic parameter init mirroring the nn.Linear shapes."""
    dims = [input_size] + list(hidden_dims) + [output_size]
    params = []
    for i in range(len(dims) - 1):
        din, dout = dims[i], dims[i + 1]
        key, kw, kb = jax.random.split(key, 3)
        # PyTorch default init scale: U(-1/sqrt(din), 1/sqrt(din))
        bound = 1.0 / jnp.sqrt(jnp.float32(din))
        w = jax.random.uniform(kw, (din, dout), jnp.float32, -bound, bound)
        b = jax.random.uniform(kb, (dout,), jnp.float32, -bound, bound)
        params.append((w, b))
    return params


def generator_fc_reference(params, x):
    out = x
    n_layers = len(params)
    for i, (w, b) in enumerate(params):
        out = out @ w + b
        if i != n_layers - 1:
            out = jnp.maximum(out, 0.0)
    return out


if __name__ == "__main__":
    key = jax.random.PRNGKey(0)

    batch = 8
    input_size = 16
    hidden_dims = [32, 64]
    output_size = 16

    key, kx, kp = jax.random.split(key, 3)
    x = jax.random.normal(kx, (batch, input_size), jnp.float32)
    params = init_generator_fc_params(kp, input_size, output_size, hidden_dims)

    # One-time parameter padding/cast (hoisted out of the forward pass).
    prepared = prepare_generator_fc_params(params)

    fwd = jax.jit(functools.partial(generator_fc_forward,
                                    output_size=output_size))
    out = jax.block_until_ready(fwd(prepared, x))

    ref = generator_fc_reference(params, x)
    assert out.shape == (batch, output_size)
    # bf16 matmul inputs with f32 accumulation -> loosened tolerance vs f32 ref.
    assert jnp.allclose(out, ref, atol=2e-2, rtol=2e-2), "mismatch vs reference"

    print("KERNEL_OK")
</pallas_src>

<mosaic_0001>
module attributes {stable_mosaic.version = 11 : i64} {
  func.func @_fused_mlp_kernel(%arg0: i32, %arg1: memref<8x128xf32, #tpu.memory_space<vmem>>, %arg2: memref<128x128xbf16, #tpu.memory_space<vmem>>, %arg3: memref<1x128xf32, #tpu.memory_space<vmem>>, %arg4: memref<128x128xbf16, #tpu.memory_space<vmem>>, %arg5: memref<1x128xf32, #tpu.memory_space<vmem>>, %arg6: memref<128x128xbf16, #tpu.memory_space<vmem>>, %arg7: memref<1x128xf32, #tpu.memory_space<vmem>>, %arg8: memref<8x128xf32, #tpu.memory_space<vmem>>) attributes {dimension_semantics = [#tpu.dimension_semantics<parallel>], iteration_bounds = array<i64: 1>, scalar_prefetch = 0 : i64, scratch_operands = 0 : i64, tpu.core_type = #tpu.core_type<tc>, window_params = [{transform_indices = @transform_0, window_bounds = array<i64: 8, 128>}, {pipeline_mode = #tpu.pipeline_mode<synchronous>, transform_indices = @transform_1, window_bounds = array<i64: 128, 128>}, {pipeline_mode = #tpu.pipeline_mode<synchronous>, transform_indices = @transform_2, window_bounds = array<i64: 1, 128>}, {pipeline_mode = #tpu.pipeline_mode<synchronous>, transform_indices = @transform_3, window_bounds = array<i64: 128, 128>}, {pipeline_mode = #tpu.pipeline_mode<synchronous>, transform_indices = @transform_4, window_bounds = array<i64: 1, 128>}, {pipeline_mode = #tpu.pipeline_mode<synchronous>, transform_indices = @transform_5, window_bounds = array<i64: 128, 128>}, {pipeline_mode = #tpu.pipeline_mode<synchronous>, transform_indices = @transform_6, window_bounds = array<i64: 1, 128>}, {transform_indices = @transform_7, window_bounds = array<i64: 8, 128>}]} {
    %c0 = arith.constant 0 : index
    %c0_0 = arith.constant 0 : index
    %0 = vector.load %arg1[%c0, %c0_0] : memref<8x128xf32, #tpu.memory_space<vmem>>, vector<8x128xf32>
    %1 = arith.truncf %0 : vector<8x128xf32> to vector<8x128xbf16>
    %c0_1 = arith.constant 0 : index
    %c0_2 = arith.constant 0 : index
    %2 = vector.load %arg2[%c0_1, %c0_2] : memref<128x128xbf16, #tpu.memory_space<vmem>>, vector<128x128xbf16>
    %cst = arith.constant dense<0.000000e+00> : vector<8x128xf32>
    %3 = tpu.matmul %1, %2, %cst {dimension_numbers = #tpu.dot_dimension_numbers<[1], [0], [0], [1], [0, 0, 1, 1], [], []>} : vector<8x128xbf16>, vector<128x128xbf16>, vector<8x128xf32> -> vector<8x128xf32>
    %c0_3 = arith.constant 0 : index
    %c0_4 = arith.constant 0 : index
    %4 = vector.load %arg3[%c0_3, %c0_4] : memref<1x128xf32, #tpu.memory_space<vmem>>, vector<1x128xf32>
    %5 = vector.broadcast %4 : vector<1x128xf32> to vector<8x128xf32>
    %6 = arith.addf %3, %5 : vector<8x128xf32>
    %cst_5 = arith.constant 0.000000e+00 : f32
    %7 = vector.broadcast %cst_5 : f32 to vector<8x128xf32>
    %8 = arith.maximumf %6, %7 : vector<8x128xf32>
    %9 = arith.truncf %8 : vector<8x128xf32> to vector<8x128xbf16>
    %c0_6 = arith.constant 0 : index
    %c0_7 = arith.constant 0 : index
    %10 = vector.load %arg4[%c0_6, %c0_7] : memref<128x128xbf16, #tpu.memory_space<vmem>>, vector<128x128xbf16>
    %cst_8 = arith.constant dense<0.000000e+00> : vector<8x128xf32>
    %11 = tpu.matmul %9, %10, %cst_8 {dimension_numbers = #tpu.dot_dimension_numbers<[1], [0], [0], [1], [0, 0, 1, 1], [], []>} : vector<8x128xbf16>, vector<128x128xbf16>, vector<8x128xf32> -> vector<8x128xf32>
    %c0_9 = arith.constant 0 : index
    %c0_10 = arith.constant 0 : index
    %12 = vector.load %arg5[%c0_9, %c0_10] : memref<1x128xf32, #tpu.memory_space<vmem>>, vector<1x128xf32>
    %13 = vector.broadcast %12 : vector<1x128xf32> to vector<8x128xf32>
    %14 = arith.addf %11, %13 : vector<8x128xf32>
    %cst_11 = arith.constant 0.000000e+00 : f32
    %15 = vector.broadcast %cst_11 : f32 to vector<8x128xf32>
    %16 = arith.maximumf %14, %15 : vector<8x128xf32>
    %17 = arith.truncf %16 : vector<8x128xf32> to vector<8x128xbf16>
    %c0_12 = arith.constant 0 : index
    %c0_13 = arith.constant 0 : index
    %18 = vector.load %arg6[%c0_12, %c0_13] : memref<128x128xbf16, #tpu.memory_space<vmem>>, vector<128x128xbf16>
    %cst_14 = arith.constant dense<0.000000e+00> : vector<8x128xf32>
    %19 = tpu.matmul %17, %18, %cst_14 {dimension_numbers = #tpu.dot_dimension_numbers<[1], [0], [0], [1], [0, 0, 1, 1], [], []>} : vector<8x128xbf16>, vector<128x128xbf16>, vector<8x128xf32> -> vector<8x128xf32>
    %c0_15 = arith.constant 0 : index
    %c0_16 = arith.constant 0 : index
    %20 = vector.load %arg7[%c0_15, %c0_16] : memref<1x128xf32, #tpu.memory_space<vmem>>, vector<1x128xf32>
    %21 = vector.broadcast %20 : vector<1x128xf32> to vector<8x128xf32>
    %22 = arith.addf %19, %21 : vector<8x128xf32>
    %c0_17 = arith.constant 0 : index
    %c0_18 = arith.constant 0 : index
    %23 = vector.load %arg8[%c0_17, %c0_18] : memref<8x128xf32, #tpu.memory_space<vmem>>, vector<8x128xf32>
    tpu.vector_store %arg8[%c0_17, %c0_18], %22 {strides = array<i32>} : memref<8x128xf32, #tpu.memory_space<vmem>>, vector<8x128xf32>,
    return
  }
  func.func @transform_0(%arg0: i32) -> (i32, i32) {
    %c0_i32 = arith.constant 0 : i32
    %c0_i32_0 = arith.constant 0 : i32
    return %arg0, %c0_i32 : i32, i32
  }
  func.func @transform_1(%arg0: i32) -> (i32, i32) {
    %c0_i32 = arith.constant 0 : i32
    %c0_i32_0 = arith.constant 0 : i32
    %c0_i32_1 = arith.constant 0 : i32
    return %c0_i32, %c0_i32_0 : i32, i32
  }
  func.func @transform_2(%arg0: i32) -> (i32, i32) {
    %c0_i32 = arith.constant 0 : i32
    %c0_i32_0 = arith.constant 0 : i32
    %c0_i32_1 = arith.constant 0 : i32
    return %c0_i32, %c0_i32_0 : i32, i32
  }
  func.func @transform_3(%arg0: i32) -> (i32, i32) {
    %c0_i32 = arith.constant 0 : i32
    %c0_i32_0 = arith.constant 0 : i32
    %c0_i32_1 = arith.constant 0 : i32
    return %c0_i32, %c0_i32_0 : i32, i32
  }
  func.func @transform_4(%arg0: i32) -> (i32, i32) {
    %c0_i32 = arith.constant 0 : i32
    %c0_i32_0 = arith.constant 0 : i32
    %c0_i32_1 = arith.constant 0 : i32
    return %c0_i32, %c0_i32_0 : i32, i32
  }
  func.func @transform_5(%arg0: i32) -> (i32, i32) {
    %c0_i32 = arith.constant 0 : i32
    %c0_i32_0 = arith.constant 0 : i32
    %c0_i32_1 = arith.constant 0 : i32
    return %c0_i32, %c0_i32_0 : i32, i32
  }
  func.func @transform_6(%arg0: i32) -> (i32, i32) {
    %c0_i32 = arith.constant 0 : i32
    %c0_i32_0 = arith.constant 0 : i32
    %c0_i32_1 = arith.constant 0 : i32
    return %c0_i32, %c0_i32_0 : i32, i32
  }
  func.func @transform_7(%arg0: i32) -> (i32, i32) {
    %c0_i32 = arith.constant 0 : i32
    %c0_i32_0 = arith.constant 0 : i32
    return %arg0, %c0_i32 : i32, i32
  }
}

</mosaic_0001>

<bundles_post_ra>
// kernel: generator_fc_forward.1
= control target key start
LH: loop header
LB: loop body
LE: loop exit
PB: predicated region body
PF: predicated region fallthrough
CT: control target
= control target key end

     0   :  { %12 = vsyncpa [#allocation3], 0  ;;  %s819_s0 = inlined_call_operand.vmem [shape: f32[8,128], index: 0, kind: input, shape index: {}]   ;;  %s820_s1 = inlined_call_operand.hbm [shape: bf16[128,128], index: 1, kind: input, shape index: {}]   ;;  %s821_s2 = inlined_call_operand.vmem [shape: f32[1,128], index: 2, kind: input, shape index: {}]   ;;  %s822_s3 = inlined_call_operand.hbm [shape: bf16[128,128], index: 3, kind: input, shape index: {}]   ;;  %s823_s4 = inlined_call_operand.vmem [shape: f32[1,128], index: 4, kind: input, shape index: {}]   ;;  %s824_s5 = inlined_call_operand.hbm [shape: bf16[128,128], index: 5, kind: input, shape index: {}]   ;;  %s825_s6 = inlined_call_operand.vmem [shape: f32[1,128], index: 6, kind: input, shape index: {}]   ;;  %s826_s7 = inlined_call_operand.hbm [shape: f32[8,128], index: 7, kind: output, shape index: {}]  }
   0x1   :  { %13 = vsyncpa [#allocation6], 0 }
   0x2   :  { %14 = vsyncpa [#allocation4], 0  ;;  %s665_s24 = smov [#allocation5]   ;;  %s666_s26 = smov [#allocation2]  }
   0x3   :  { %s36_s25 = sshll.u32 %s665_s24, 4  ;;  %s22_s27 = sshll.u32 %s666_s26, 4  ;;  %s37_s25 = int_to_ptr.vmem [resolvable:$true] %s36_s25  ;;  %s713_s27 = int_to_ptr.vmem [resolvable:$true] %s22_s27 }
   0x4   :  { %s571_s30 = scalar_lea.hbm %s822_s3, 1024 }
   0x5   :  { %p572_p0 = scmp.ne.s32.totalorder %s822_s3, %s571_s30  ;;  %p575_p1 = scmp.lt.u32.totalorder %s571_s30, %s822_s3 }
   0x7   :  { %p577_p2 = pnand %p575_p1, %p572_p0 }
   0x9   :  { %580 = shalt.err (!%p577_p2)
}
   0xa   :  { %s581_s12 = scalar_lea.vmem %s37_s25, 1024  ;;  %p586_p4 = scmp.lt.s32.totalorder %s37_s25, %s37_s25 }
   0xb   :  { %p582_p3 = scmp.ne.s32.totalorder %s37_s25, %s581_s12  ;;  %p587_p5 = scmp.lt.s32.totalorder %s581_s12, %s581_s12 }
   0xd   :  { %p588_p6 = por %p587_p5, %p586_p4 }
   0xf   :  { %p589_p7 = pnand %p588_p6, %p582_p3 }
  0x11   :  { %592 = shalt.err (!%p589_p7)
}
  0x12   :  { %s667_s13 = smov 64   ;;  %s668_s14 = smov 4  }
  0x13   :  { %42 = dma.hbm_to_vmem [thread:$0]  %s822_s3, 1024, %s37_s25, [#allocation6], %s667_s13, %s667_s13, %s668_s14  }
  0x14   :  { %s593_s19 = scalar_lea.hbm %s820_s1, 1024 }
  0x15   :  { %p594_p8 = scmp.ne.s32.totalorder %s820_s1, %s593_s19  ;;  %p597_p9 = scmp.lt.u32.totalorder %s593_s19, %s820_s1 }
  0x17   :  { %p599_p10 = pnand %p597_p9, %p594_p8 }
  0x19   :  { %602 = shalt.err (!%p599_p10)
}
  0x1a   :  { %s603_s24 = scalar_lea.vmem %s713_s27, 1024  ;;  %p608_p12 = scmp.lt.s32.totalorder %s713_s27, %s713_s27 }
  0x1b   :  { %p604_p11 = scmp.ne.s32.totalorder %s713_s27, %s603_s24  ;;  %p609_p13 = scmp.lt.s32.totalorder %s603_s24, %s603_s24 }
  0x1d   :  { %p610_p0 = por %p609_p13, %p608_p12 }
  0x1f   :  { %p611_p1 = pnand %p610_p0, %p604_p11 }
  0x21   :  { %614 = shalt.err (!%p611_p1)
}
  0x22   :  { %28 = dma.hbm_to_vmem [thread:$0]  %s820_s1, 1024, %s713_s27, [#allocation3], %s667_s13, %s667_s13, %s668_s14  }
  0x23   :  { %s669_s26 = smov [#allocation7]   ;;  %s615_s8 = scalar_lea.hbm %s824_s5, 1024 }
  0x24   :  { %s50_s28 = sshll.u32 %s669_s26, 4  ;;  %p616_p2 = scmp.ne.s32.totalorder %s824_s5, %s615_s8  ;;  %s51_s28 = int_to_ptr.vmem [resolvable:$true] %s50_s28 }
  0x25   :  { %p619_p3 = scmp.lt.u32.totalorder %s615_s8, %s824_s5 }
  0x27   :  { %p621_p4 = pnand %p619_p3, %p616_p2 }
  0x29   :  { %624 = shalt.err (!%p621_p4)
}
  0x2a   :  { %s625_s15 = scalar_lea.vmem %s51_s28, 1024  ;;  %p630_p6 = scmp.lt.s32.totalorder %s51_s28, %s51_s28 }
  0x2b   :  { %p626_p5 = scmp.ne.s32.totalorder %s51_s28, %s625_s15  ;;  %p631_p7 = scmp.lt.s32.totalorder %s625_s15, %s625_s15 }
  0x2d   :  { %p632_p8 = por %p631_p7, %p630_p6 }
  0x2f   :  { %p633_p9 = pnand %p632_p8, %p626_p5 }
  0x31   :  { %636 = shalt.err (!%p633_p9)
}
  0x32   :  { %56 = dma.hbm_to_vmem [thread:$0]  %s824_s5, 1024, %s51_s28, [#allocation6], %s667_s13, %s667_s13, %s668_s14  }
  0x33   :  { %659 = dma.done.wait [#allocation3], 1024  }
  0x34   :  { %660 = vsyncadd [#allocation3], 4294966272 }
  0x35   :  { %661 = dma.done.wait [#allocation6], 2048  }
  0x36   :  { %662 = vsyncadd [#allocation6], 4294965248  ;;  %v670_v0 = vmov 0.0   ;;  %vm671_vm0 = vmmov 0   ;;  %v547_v1 = vld [vmem:[#allocation2] sm:$0xff]   ;;  %v548_v2 = vld [vmem:[#allocation2 + $0x8] sm:$0xff]  }
  0x37   :  { %479 = vmatprep.subr.bf16.mxu0 %v670_v0  ;;  %495 = vmatprep.mubr.msk.bf16.mxu0 %vm671_vm0, %v670_v0  ;;  %v549_v3 = vld [vmem:[#allocation2 + $0x10] sm:$0xff]   ;;  %v555_v4 = vld [vmem:[#allocation5] sm:$0xff]   ;;  %v550_v5 = vld [vmem:[#allocation2 + $0x18] sm:$0xff]   ;;  %s672_s19 = smov [#allocation8]  }
  0x38   :  { %499 = vmatprep.subr.bf16.mxu1 %v670_v0  ;;  %515 = vmatprep.mubr.msk.bf16.mxu1 %vm671_vm0, %v670_v0  ;;  %v556_v6 = vld [vmem:[#allocation5 + $0x8] sm:$0xff]   ;;  %v551_v7 = vld [vmem:[#allocation2 + $0x20] sm:$0xff]   ;;  %v557_v8 = vld [vmem:[#allocation5 + $0x10] sm:$0xff]   ;;  %s415_s20 = sshll.u32 %s672_s19, 4  ;;  %s416_s20 = int_to_ptr.vmem [resolvable:$true] %s415_s20 }
  0x39   :  { %480 = vmatpush3.bf16.msra.mxu0 %v547_v1  ;;  %500 = vmatpush3.bf16.msra.mxu1 %v555_v4  ;;  %v552_v9 = vld [vmem:[#allocation2 + $0x28] sm:$0xff]   ;;  %v558_v10 = vld [vmem:[#allocation5 + $0x18] sm:$0xff]   ;;  %v553_v11 = vld [vmem:[#allocation2 + $0x30] sm:$0xff]   ;;  %p642_p11 = scmp.lt.s32.totalorder %s416_s20, %s416_s20 }
  0x3a   :  { %481 = vmatprep.subr.bf16.mxu0 %v670_v0  ;;  %501 = vmatprep.subr.bf16.mxu1 %v670_v0  ;;  %v559_v12 = vld [vmem:[#allocation5 + $0x20] sm:$0xff]   ;;  %v554_v13 = vld [vmem:[#allocation2 + $0x38] sm:$0xff]   ;;  %v560_v15 = vld [vmem:[#allocation5 + $0x28] sm:$0xff]  }
  0x3b   :  { %v69_v14 = vld [vmem:[%s819_s0] sm:$0xff]  ;;  %v561_v17 = vld [vmem:[#allocation5 + $0x30] sm:$0xff]   ;;  %v562_v18 = vld [vmem:[#allocation5 + $0x38] sm:$0xff]  }
  0x3c   :  { %v70_v16 = vpack.c.bf16 %v69_v14, %v69_v14  ;;  %v563_v19 = vld [vmem:[#allocation7] sm:$0xff]   ;;  %v564_v20 = vld [vmem:[#allocation7 + $0x8] sm:$0xff]   ;;  %v565_v21 = vld [vmem:[#allocation7 + $0x10] sm:$0xff]  }
  0x3d   :  { %482 = vmatpush3.bf16.msra.mxu0 %v548_v2  ;;  %502 = vmatpush3.bf16.msra.mxu1 %v556_v6  ;;  %v566_v22 = vld [vmem:[#allocation7 + $0x18] sm:$0xff]   ;;  %v567_v23 = vld [vmem:[#allocation7 + $0x20] sm:$0xff]   ;;  %v568_v24 = vld [vmem:[#allocation7 + $0x28] sm:$0xff]  }
  0x3e   :  { %483 = vmatprep.subr.bf16.mxu0 %v670_v0  ;;  %503 = vmatprep.subr.bf16.mxu1 %v670_v0  ;;  %v425_v25 = vld [vmem:[%s821_s2] ss:$0 sm:$0xff]  ;;  %v569_v33 = vld [vmem:[#allocation7 + $0x30] sm:$0xff]   ;;  %v570_v34 = vld [vmem:[#allocation7 + $0x38] sm:$0xff]  }
  0x3f   :  { %v434_v35 = vld [vmem:[%s823_s4] ss:$0 sm:$0xff]  ;;  %s637_s4 = scalar_lea.vmem %s416_s20, 128 }
  0x40   :  { %v443_v43 = vld [vmem:[%s825_s6] ss:$0 sm:$0xff]  ;;  %p638_p10 = scmp.ne.s32.totalorder %s416_s20, %s637_s4  ;;  %p643_p12 = scmp.lt.s32.totalorder %s637_s4, %s637_s4 }
  0x41   :  { %484 = vmatpush3.bf16.msra.mxu0 %v549_v3  ;;  %504 = vmatpush3.bf16.msra.mxu1 %v557_v8 }
  0x42   :  { %485 = vmatprep.subr.bf16.mxu0 %v670_v0  ;;  %505 = vmatprep.subr.bf16.mxu1 %v670_v0  ;;  %p644_p13 = por %p643_p12, %p642_p11 }
  0x44   :  { %p645_p0 = pnand %p644_p13, %p638_p10 }
  0x45   :  { %486 = vmatpush3.bf16.msra.mxu0 %v550_v5  ;;  %506 = vmatpush3.bf16.msra.mxu1 %v558_v10 }
  0x46   :  { %487 = vmatprep.subr.bf16.mxu0 %v670_v0  ;;  %507 = vmatprep.subr.bf16.mxu1 %v670_v0 }
  0x49   :  { %488 = vmatpush3.bf16.msra.mxu0 %v551_v7  ;;  %508 = vmatpush3.bf16.msra.mxu1 %v559_v12 }
  0x4a   :  { %489 = vmatprep.subr.bf16.mxu0 %v670_v0  ;;  %509 = vmatprep.subr.bf16.mxu1 %v670_v0 }
  0x4d   :  { %490 = vmatpush3.bf16.msra.mxu0 %v552_v9  ;;  %510 = vmatpush3.bf16.msra.mxu1 %v560_v15 }
  0x4e   :  { %491 = vmatprep.subr.bf16.mxu0 %v670_v0  ;;  %511 = vmatprep.subr.bf16.mxu1 %v670_v0 }
  0x51   :  { %492 = vmatpush3.bf16.msra.mxu0 %v553_v11  ;;  %512 = vmatpush3.bf16.msra.mxu1 %v561_v17 }
  0x52   :  { %493 = vmatprep.subr.bf16.mxu0 %v670_v0  ;;  %513 = vmatprep.subr.bf16.mxu1 %v670_v0 }
  0x55   :  { %494 = vmatpush3.bf16.msra.mxu0 %v554_v13  ;;  %514 = vmatpush3.bf16.msra.mxu1 %v562_v18 }
  0x56   :  { %519 = vmatprep.subr.bf16.mxu0 %v670_v0 }
  0x58   :  { %496 = vmatmul.mubr.bf16.vlgmr.msra.gmra.mrb[0].mxu0 %v70_v16 }
  0x59   :  { %535 = vmatprep.mubr.msk.bf16.mxu0 %vm671_vm0, %v670_v0  ;;  %520 = vmatpush3.bf16.msra.mxu0 %v563_v19 }
  0x5a   :  { %521 = vmatprep.subr.bf16.mxu0 %v670_v0 }
  0x5d   :  { %522 = vmatpush3.bf16.msra.mxu0 %v564_v20 }
  0x5e   :  { %523 = vmatprep.subr.bf16.mxu0 %v670_v0 }
  0x61   :  { %524 = vmatpush3.bf16.msra.mxu0 %v565_v21 }
  0x62   :  { %525 = vmatprep.subr.bf16.mxu0 %v670_v0 }
  0x65   :  { %526 = vmatpush3.bf16.msra.mxu0 %v566_v22 }
  0x66   :  { %527 = vmatprep.subr.bf16.mxu0 %v670_v0 }
  0x69   :  { %528 = vmatpush3.bf16.msra.mxu0 %v567_v23 }
  0x6a   :  { %529 = vmatprep.subr.bf16.mxu0 %v670_v0 }
  0x6d   :  { %530 = vmatpush3.bf16.msra.mxu0 %v568_v24 }
  0x6e   :  { %531 = vmatprep.subr.bf16.mxu0 %v670_v0 }
  0x71   :  { %532 = vmatpush3.bf16.msra.mxu0 %v569_v33 }
  0x72   :  { %533 = vmatprep.subr.bf16.mxu0 %v670_v0 }
  0x75   :  { %534 = vmatpush3.bf16.msra.mxu0 %v570_v34 }
 0x12b   :  { %v176_v26 = vpop.f32.mrb[0].mxu0 }
 0x12c   :  { %v177_v27 = vadd.f32 %v425_v25, %v176_v26  ;;  %v497_v28 = vpop.f32.mrb[1].mxu0 }
 0x12d   :  { %v179_v29 = vpop.f32.mrb[2].mxu0 }
 0x12e   :  { %v182_v30 = vmax.f32 %v177_v27, 0.0  ;;  %v498_v31 = vpop.f32.mrb[3].mxu0 }
 0x130   :  { %v183_v32 = vpack.c.bf16 %v182_v30, %v182_v30 }
 0x132   :  { %516 = vmatmul.mubr.bf16.vlgmr.msra.gmra.mrb[0].mxu1 %v183_v32 }
 0x205   :  { %v289_v36 = vpop.f32.mrb[0].mxu1 }
 0x206   :  { %v290_v37 = vadd.f32 %v434_v35, %v289_v36  ;;  %v517_v38 = vpop.f32.mrb[1].mxu1 }
 0x207   :  { %v292_v39 = vpop.f32.mrb[2].mxu1 }
 0x208   :  { %v295_v40 = vmax.f32 %v290_v37, 0.0  ;;  %v518_v41 = vpop.f32.mrb[3].mxu1 }
 0x20a   :  { %v296_v42 = vpack.c.bf16 %v295_v40, %v295_v40 }
 0x20c   :  { %536 = vmatmul.mubr.bf16.vlgmr.msra.gmra.mrb[4].mxu0 %v296_v42 }
 0x2df   :  { %v402_v44 = vpop.f32.mrb[4].mxu0 }
 0x2e0   :  { %v403_v45 = vadd.f32 %v443_v43, %v402_v44  ;;  %v537_v46 = vpop.f32.mrb[5].mxu0 }
 0x2e1   :  { %v405_v47 = vpop.f32.mrb[6].mxu0 }
 0x2e2   :  { %408 = vst [vmem:[#allocation8] sm:$0xff] %v403_v45  ;;  %v538_v48 = vpop.f32.mrb[7].mxu0 }
 0x2e3   :  { %648 = shalt.err (!%p645_p0)
}
 0x2e4   :  { %s649_s6 = scalar_lea.hbm %s826_s7, 128 }
 0x2e5   :  { %p650_p1 = scmp.ne.s32.totalorder %s826_s7, %s649_s6  ;;  %p653_p2 = scmp.lt.u32.totalorder %s649_s6, %s826_s7 }
 0x2e7   :  { %p655_p3 = pnand %p653_p2, %p650_p1 }
 0x2e9   :  { %658 = shalt.err (!%p655_p3)
}
 0x2ea   :  { %418 = dma.vmem_to_hbm [thread:$0]  %s416_s20, 128, %s826_s7, [#allocation4]  }
 0x2eb   :  { %663 = dma.done.wait [#allocation4], 128  }
 0x2ec   :  { %664 = vsyncadd [#allocation4], 4294967168 }
 0x2ed   :  { %422 = vsyncpa [#allocation3], 1 }
 0x2ee   :  { %423 = vsyncpa [#allocation6], 1 }
 0x2ef   :  { %424 = vsyncpa [#allocation4], 1 }

</bundles_post_ra>
